<compile_context>
chip_gen: v5e
topology: v5e:2x2
jax: 0.10.0
libtpu: 0.0.40
codegen_flags: <defaults>
</compile_context>

<pallas_src>
from math import log2

import jax
import jax.numpy as jnp
import numpy as np
from jax.experimental import pallas as pl
from jax.experimental.pallas import tpu as pltpu

LANE = 128


def cnn_kernel(x_ref, w1_ref, b1_ref, w2_ref, b2_ref, w3_ref, b3_ref, o_ref):
    # x_ref:  (W*C, TB)      batch-in-lanes input block (bf16 or f32)
    # w1_ref: (Lout*C, W*C)  banded conv1 weight (same dtype as x)
    # b1_ref: (Lout*C, 1)    conv1 bias, tiled over output positions (f32)
    # w2_ref: (H, Lout*C)    conv2 weight, (l, c_in)-minor flattened (f32)
    # b2_ref: (H, 1)
    # w3_ref: (F, H)         linear weight, PyTorch layout (f32)
    # b3_ref: (F, 1)
    # o_ref:  (F, TB)        lane-dense output block (f32)

    # conv1 (k=3) == one banded matmul; f32 accumulate, f32 bias + relu.
    h1 = jnp.dot(w1_ref[...], x_ref[...], preferred_element_type=jnp.float32)
    h1 = jnp.maximum(h1 + b1_ref[...], 0.0)                       # (Lout*C, TB)

    # conv2 (kernel spans the whole remaining length -> length-1 output).
    # Kept in f32: no bf16 repack on the VPU (matters on v5e), MXU has slack.
    h2 = jnp.dot(w2_ref[...], h1, preferred_element_type=jnp.float32)
    h2 = jnp.maximum(h2 + b2_ref[...], 0.0)                       # (H, TB)

    # linear + relu.
    y = jnp.dot(w3_ref[...], h2, preferred_element_type=jnp.float32)
    o_ref[...] = jnp.maximum(y + b3_ref[...], 0.0).astype(o_ref.dtype)


def _vmem_capacity_bytes() -> int:
    """Best-effort per-core VMEM capacity; conservative (v7x-safe) fallback."""
    try:
        cap = int(pltpu.get_tpu_info().vmem_capacity_bytes)
        if cap > 0:
            return cap
    except Exception:
        pass
    try:
        kind = jax.devices()[0].device_kind.lower()
        if "v5" in kind or "v6" in kind:
            return 128 * 1024 * 1024
    except Exception:
        pass
    return 64 * 1024 * 1024


def cnn_forward(x_ncw, w1, b1, w2, b2, w3, b3, *,
                block_batch=None, compute_dtype=jnp.bfloat16):
    """x_ncw: (N, C, W) float32; weights in PyTorch layouts.

    w1: (C, C, K)   b1: (C,)
    w2: (H, C, K2)  b2: (H,)        K2 = W - K + 1
    w3: (F, H)      b3: (F,)
    returns (N, F) float32
    """
    N, C, W = x_ncw.shape
    K = w1.shape[-1]                       # 3
    Lout = W - K + 1                       # W - 2
    H = w2.shape[0]
    F = w3.shape[0]
    in_bytes = jnp.dtype(compute_dtype).itemsize

    # ---- weight re-layout (trace-time JAX glue, fused into the host graph) ----
    # Banded conv1 matrix, batch-in-lanes orientation:
    #   band_t[l*C + c_out, c_in*W + (l + k)] = w1[c_out, c_in, k]
    # Column order c_in*W + w matches x.reshape(N, C*W), so the input reshape
    # is zero-copy; only one transpose pass is needed in the wrapper.
    # TODO(synk): for much larger W/C replace the dense band (O(W*C x Lout*C))
    # with K accumulated shifted matmuls.
    w1_koc = jnp.transpose(w1, (2, 0, 1))                   # (K, Cout, Cin)
    band_t = jnp.zeros((Lout * C, W * C), jnp.float32)
    for l in range(Lout):
        for k in range(K):
            band_t = band_t.at[l * C:(l + 1) * C, (l + k)::W].set(w1_koc[k])
    b1_col = jnp.tile(b1, (Lout,)).reshape(Lout * C, 1)      # (Lout*C, 1)

    w2_t = jnp.transpose(w2, (0, 2, 1)).reshape(H, Lout * C)  # (H, Lout*C)
    b2_col = b2.reshape(H, 1)
    w3_f = w3                                                  # (F, H) as-is
    b3_col = b3.reshape(F, 1)

    # Only the streamed input + band go to bf16 (halves input HBM traffic);
    # everything downstream of matmul 1 stays f32.
    band_t = band_t.astype(compute_dtype)

    # ---- batch tiling: lane-aligned blocks sized by VMEM generation ----------
    vmem_cap = _vmem_capacity_bytes()
    if block_batch is None:
        block_batch = 16384 if vmem_cap <= (64 << 20) else 32768

    tb = min(int(block_batch), pl.cdiv(N, LANE) * LANE)
    tb = max(LANE, (tb // LANE) * LANE)
    n_steps = pl.cdiv(N, tb)
    # Keep an even number of grid steps so v7x's two TensorCores balance.
    if n_steps > 1 and n_steps % 2 == 1:
        n_steps += 1
        tb = max(LANE, pl.cdiv(pl.cdiv(N, n_steps), LANE) * LANE)
        n_steps = pl.cdiv(N, tb)
    n_pad = n_steps * tb

    # Lane-dense input: (W*C, N_pad), batch on lanes.  reshape is zero-copy;
    # transpose + cast + pad fuse into a single XLA pass over the input.
    x_t = jnp.transpose(x_ncw.reshape(N, W * C)).astype(compute_dtype)
    if n_pad != N:
        x_t = jnp.pad(x_t, ((0, 0), (0, n_pad - N)))

    # VMEM budget: double-buffered input/output blocks + f32 intermediates,
    # with 2x margin, clamped to the generation's capacity minus headroom.
    per_col = (2 * in_bytes * (W * C)           # input block, 2 buffers
               + 2 * 4 * F                      # output block, 2 buffers
               + 2 * 4 * (Lout * C + H))        # f32 h1/h2 temporaries + slack
    est = per_col * tb + (2 << 20)
    vmem_limit = int(min(vmem_cap - (16 << 20), max(2 * est, 32 << 20)))

    def full_spec(shape):  # weights/biases: same (whole-array) block every step
        return pl.BlockSpec(shape, lambda i: (0, 0))

    out = pl.pallas_call(
        cnn_kernel,
        out_shape=jax.ShapeDtypeStruct((F, n_pad), jnp.float32),
        grid_spec=pltpu.PrefetchScalarGridSpec(
            num_scalar_prefetch=0,
            grid=(n_steps,),
            in_specs=[
                pl.BlockSpec((W * C, tb), lambda i: (0, i)),
                full_spec((Lout * C, W * C)),
                full_spec((Lout * C, 1)),
                full_spec((H, Lout * C)),
                full_spec((H, 1)),
                full_spec((F, H)),
                full_spec((F, 1)),
            ],
            out_specs=pl.BlockSpec((F, tb), lambda i: (0, i)),
        ),
        compiler_params=pltpu.CompilerParams(
            dimension_semantics=("parallel",),   # shard batch blocks over TCs
            vmem_limit_bytes=vmem_limit,
        ),
    )(x_t, band_t, b1_col, w2_t, b2_col, w3_f, b3_col)

    return jnp.transpose(out[:, :N])             # (N, F); tiny final transpose


def cnn_ref(x_ncw, w1, b1, w2, b2, w3, b3):
    """Pure-JAX f32 reference matching the PyTorch forward."""
    K = w1.shape[-1]
    W = x_ncw.shape[-1]
    Lout = W - K + 1
    h1 = sum(
        jnp.einsum("ncl,oc->nol", x_ncw[:, :, k:k + Lout], w1[:, :, k])
        for k in range(K)
    ) + b1[None, :, None]
    h1 = jnp.maximum(h1, 0.0)
    h2 = jnp.einsum("ncl,hcl->nh", h1, w2) + b2[None, :]
    h2 = jnp.maximum(h2, 0.0)
    y = h2 @ w3.T + b3[None, :]
    return jnp.maximum(y, 0.0)


if __name__ == "__main__":
    # Small shapes consistent with the module.
    window_size = 8
    raw_market_data_size = 4
    out_features = 3
    batch = 2

    kernel_size = 3
    hidden_dim = 2 ** max(5, round(log2(raw_market_data_size)))   # 32
    k2 = window_size + 1 - kernel_size                            # conv2 kernel = W - 2

    key = jax.random.PRNGKey(0)
    ks = jax.random.split(key, 8)
    # Deterministic parameter init (PyTorch weight layouts).
    w1 = jax.random.normal(ks[0], (raw_market_data_size, raw_market_data_size, kernel_size), jnp.float32) * 0.2
    b1 = jax.random.normal(ks[1], (raw_market_data_size,), jnp.float32) * 0.1
    w2 = jax.random.normal(ks[2], (hidden_dim, raw_market_data_size, k2), jnp.float32) * 0.2
    b2 = jax.random.normal(ks[3], (hidden_dim,), jnp.float32) * 0.1
    w3 = jax.random.normal(ks[4], (out_features, hidden_dim), jnp.float32) * 0.2
    b3 = jax.random.normal(ks[5], (out_features,), jnp.float32) * 0.1
    x = jax.random.normal(ks[6], (batch, raw_market_data_size, window_size), jnp.float32)

    ref = jax.block_until_ready(cnn_ref(x, w1, b1, w2, b2, w3, b3))

    # f32 compute path: matches the reference tightly.
    out_f32 = jax.block_until_ready(
        cnn_forward(x, w1, b1, w2, b2, w3, b3, compute_dtype=jnp.float32))
    np.testing.assert_allclose(np.asarray(out_f32), np.asarray(ref), rtol=1e-4, atol=1e-4)

    # Default bf16 first-matmul path (f32 accumulate): loose tolerance.
    out_bf16 = jax.block_until_ready(cnn_forward(x, w1, b1, w2, b2, w3, b3))
    assert out_bf16.shape == (batch, out_features)
    np.testing.assert_allclose(np.asarray(out_bf16), np.asarray(ref), rtol=2e-2, atol=2e-2)

    # Larger, non-aligned batch with a small block to exercise the multi-step
    # pipelined grid (even step count), padding, and output slicing.
    xb = jax.random.normal(ks[7], (1537, raw_market_data_size, window_size), jnp.float32)
    refb = jax.block_until_ready(cnn_ref(xb, w1, b1, w2, b2, w3, b3))
    outb = jax.block_until_ready(cnn_forward(xb, w1, b1, w2, b2, w3, b3, block_batch=512))
    assert outb.shape == (1537, out_features)
    np.testing.assert_allclose(np.asarray(outb), np.asarray(refb), rtol=2e-2, atol=2e-2)

    print("KERNEL_OK")
</pallas_src>

<mosaic_0001>
module attributes {stable_mosaic.version = 11 : i64} {
  func.func @cnn_kernel(%arg0: i32, %arg1: memref<32x128xf32, #tpu.memory_space<vmem>>, %arg2: memref<24x32xf32, #tpu.memory_space<vmem>>, %arg3: memref<24x1xf32, #tpu.memory_space<vmem>>, %arg4: memref<32x24xf32, #tpu.memory_space<vmem>>, %arg5: memref<32x1xf32, #tpu.memory_space<vmem>>, %arg6: memref<3x32xf32, #tpu.memory_space<vmem>>, %arg7: memref<3x1xf32, #tpu.memory_space<vmem>>, %arg8: memref<3x128xf32, #tpu.memory_space<vmem>>) attributes {dimension_semantics = [#tpu.dimension_semantics<parallel>], iteration_bounds = array<i64: 1>, scalar_prefetch = 0 : i64, scratch_operands = 0 : i64, tpu.core_type = #tpu.core_type<tc>, window_params = [{transform_indices = @transform_0, window_bounds = array<i64: 32, 128>}, {pipeline_mode = #tpu.pipeline_mode<synchronous>, transform_indices = @transform_1, window_bounds = array<i64: 24, 32>}, {pipeline_mode = #tpu.pipeline_mode<synchronous>, transform_indices = @transform_2, window_bounds = array<i64: 24, 1>}, {pipeline_mode = #tpu.pipeline_mode<synchronous>, transform_indices = @transform_3, window_bounds = array<i64: 32, 24>}, {pipeline_mode = #tpu.pipeline_mode<synchronous>, transform_indices = @transform_4, window_bounds = array<i64: 32, 1>}, {pipeline_mode = #tpu.pipeline_mode<synchronous>, transform_indices = @transform_5, window_bounds = array<i64: 3, 32>}, {pipeline_mode = #tpu.pipeline_mode<synchronous>, transform_indices = @transform_6, window_bounds = array<i64: 3, 1>}, {transform_indices = @transform_7, window_bounds = array<i64: 3, 128>}]} {
    %c0 = arith.constant 0 : index
    %c0_0 = arith.constant 0 : index
    %0 = vector.load %arg2[%c0, %c0_0] : memref<24x32xf32, #tpu.memory_space<vmem>>, vector<24x32xf32>
    %c0_1 = arith.constant 0 : index
    %c0_2 = arith.constant 0 : index
    %1 = vector.load %arg1[%c0_1, %c0_2] : memref<32x128xf32, #tpu.memory_space<vmem>>, vector<32x128xf32>
    %cst = arith.constant dense<0.000000e+00> : vector<24x128xf32>
    %2 = tpu.matmul %0, %1, %cst {dimension_numbers = #tpu.dot_dimension_numbers<[1], [0], [0], [1], [0, 0, 1, 1], [], []>} : vector<24x32xf32>, vector<32x128xf32>, vector<24x128xf32> -> vector<24x128xf32>
    %c0_3 = arith.constant 0 : index
    %c0_4 = arith.constant 0 : index
    %3 = vector.load %arg3[%c0_3, %c0_4] : memref<24x1xf32, #tpu.memory_space<vmem>>, vector<24x1xf32>
    %4 = vector.broadcast %3 : vector<24x1xf32> to vector<24x128xf32>
    %5 = arith.addf %2, %4 : vector<24x128xf32>
    %cst_5 = arith.constant 0.000000e+00 : f32
    %6 = vector.broadcast %cst_5 : f32 to vector<24x128xf32>
    %7 = arith.maximumf %5, %6 : vector<24x128xf32>
    %c0_6 = arith.constant 0 : index
    %c0_7 = arith.constant 0 : index
    %8 = vector.load %arg4[%c0_6, %c0_7] : memref<32x24xf32, #tpu.memory_space<vmem>>, vector<32x24xf32>
    %cst_8 = arith.constant dense<0.000000e+00> : vector<32x128xf32>
    %9 = tpu.matmul %8, %7, %cst_8 {dimension_numbers = #tpu.dot_dimension_numbers<[1], [0], [0], [1], [0, 0, 1, 1], [], []>} : vector<32x24xf32>, vector<24x128xf32>, vector<32x128xf32> -> vector<32x128xf32>
    %c0_9 = arith.constant 0 : index
    %c0_10 = arith.constant 0 : index
    %10 = vector.load %arg5[%c0_9, %c0_10] : memref<32x1xf32, #tpu.memory_space<vmem>>, vector<32x1xf32>
    %11 = vector.broadcast %10 : vector<32x1xf32> to vector<32x128xf32>
    %12 = arith.addf %9, %11 : vector<32x128xf32>
    %cst_11 = arith.constant 0.000000e+00 : f32
    %13 = vector.broadcast %cst_11 : f32 to vector<32x128xf32>
    %14 = arith.maximumf %12, %13 : vector<32x128xf32>
    %c0_12 = arith.constant 0 : index
    %c0_13 = arith.constant 0 : index
    %15 = vector.load %arg6[%c0_12, %c0_13] : memref<3x32xf32, #tpu.memory_space<vmem>>, vector<3x32xf32>
    %cst_14 = arith.constant dense<0.000000e+00> : vector<3x128xf32>
    %16 = tpu.matmul %15, %14, %cst_14 {dimension_numbers = #tpu.dot_dimension_numbers<[1], [0], [0], [1], [0, 0, 1, 1], [], []>} : vector<3x32xf32>, vector<32x128xf32>, vector<3x128xf32> -> vector<3x128xf32>
    %c0_15 = arith.constant 0 : index
    %c0_16 = arith.constant 0 : index
    %17 = vector.load %arg7[%c0_15, %c0_16] : memref<3x1xf32, #tpu.memory_space<vmem>>, vector<3x1xf32>
    %18 = vector.broadcast %17 : vector<3x1xf32> to vector<3x128xf32>
    %19 = arith.addf %16, %18 : vector<3x128xf32>
    %cst_17 = arith.constant 0.000000e+00 : f32
    %20 = vector.broadcast %cst_17 : f32 to vector<3x128xf32>
    %21 = arith.maximumf %19, %20 : vector<3x128xf32>
    %c0_18 = arith.constant 0 : index
    %c0_19 = arith.constant 0 : index
    %22 = vector.load %arg8[%c0_18, %c0_19] : memref<3x128xf32, #tpu.memory_space<vmem>>, vector<3x128xf32>
    tpu.vector_store %arg8[%c0_18, %c0_19], %21 {strides = array<i32>} : memref<3x128xf32, #tpu.memory_space<vmem>>, vector<3x128xf32>,
    return
  }
  func.func @transform_0(%arg0: i32) -> (i32, i32) {
    %c0_i32 = arith.constant 0 : i32
    %c0_i32_0 = arith.constant 0 : i32
    return %c0_i32, %arg0 : i32, i32
  }
  func.func @transform_1(%arg0: i32) -> (i32, i32) {
    %c0_i32 = arith.constant 0 : i32
    %c0_i32_0 = arith.constant 0 : i32
    %c0_i32_1 = arith.constant 0 : i32
    return %c0_i32, %c0_i32_0 : i32, i32
  }
  func.func @transform_2(%arg0: i32) -> (i32, i32) {
    %c0_i32 = arith.constant 0 : i32
    %c0_i32_0 = arith.constant 0 : i32
    %c0_i32_1 = arith.constant 0 : i32
    return %c0_i32, %c0_i32_0 : i32, i32
  }
  func.func @transform_3(%arg0: i32) -> (i32, i32) {
    %c0_i32 = arith.constant 0 : i32
    %c0_i32_0 = arith.constant 0 : i32
    %c0_i32_1 = arith.constant 0 : i32
    return %c0_i32, %c0_i32_0 : i32, i32
  }
  func.func @transform_4(%arg0: i32) -> (i32, i32) {
    %c0_i32 = arith.constant 0 : i32
    %c0_i32_0 = arith.constant 0 : i32
    %c0_i32_1 = arith.constant 0 : i32
    return %c0_i32, %c0_i32_0 : i32, i32
  }
  func.func @transform_5(%arg0: i32) -> (i32, i32) {
    %c0_i32 = arith.constant 0 : i32
    %c0_i32_0 = arith.constant 0 : i32
    %c0_i32_1 = arith.constant 0 : i32
    return %c0_i32, %c0_i32_0 : i32, i32
  }
  func.func @transform_6(%arg0: i32) -> (i32, i32) {
    %c0_i32 = arith.constant 0 : i32
    %c0_i32_0 = arith.constant 0 : i32
    %c0_i32_1 = arith.constant 0 : i32
    return %c0_i32, %c0_i32_0 : i32, i32
  }
  func.func @transform_7(%arg0: i32) -> (i32, i32) {
    %c0_i32 = arith.constant 0 : i32
    %c0_i32_0 = arith.constant 0 : i32
    return %c0_i32, %arg0 : i32, i32
  }
}

</mosaic_0001>

<bundles_post_ra>
// kernel: tpu_custom_call.1
= control target key start
LH: loop header
LB: loop body
LE: loop exit
PB: predicated region body
PF: predicated region fallthrough
CT: control target
= control target key end

     0   :  { %v259_v3 = vmov 0   ;;  %s368_s0 = inlined_call_operand.vmem [shape: f32[32,128], index: 0, kind: input, shape index: {}]   ;;  %s369_s1 = inlined_call_operand.vmem [shape: f32[24,32], index: 1, kind: input, shape index: {}]   ;;  %s370_s2 = inlined_call_operand.vmem [shape: f32[24,1], index: 2, kind: input, shape index: {}]   ;;  %s371_s3 = inlined_call_operand.vmem [shape: f32[32,24], index: 3, kind: input, shape index: {}]   ;;  %s372_s4 = inlined_call_operand.vmem [shape: f32[32,1], index: 4, kind: input, shape index: {}]   ;;  %s373_s5 = inlined_call_operand.vmem [shape: f32[3,32], index: 5, kind: input, shape index: {}]   ;;  %s374_s6 = inlined_call_operand.vmem [shape: f32[3,1], index: 6, kind: input, shape index: {}]   ;;  %s375_s7 = inlined_call_operand.hbm [shape: f32[3,128], index: 7, kind: output, shape index: {}]  }
   0x1   :  { %v33_v0 = vld [vmem:[%s368_s0 + $0x18] sm:$0xff]  ;;  %v36_v1 = vld [vmem:[%s370_s2 + $0x10] sm:$0xff]  ;;  %230 = vset.pattern.permute.xlu0 %v259_v3  ;;  %v31_v4 = vld [vmem:[%s368_s0 + $0x8] sm:$0xff]  ;;  %231 = vset.pattern.permute.xlu1 %v259_v3 }
   0x2   :  { %v32_v2 = vld [vmem:[%s368_s0 + $0x10] sm:$0xff]  ;;  %74 = vmatpush.msra.mxu0 %v33_v0  ;;  %221 = vmatpush.msra.mxu1 %v33_v0  ;;  %v34_v5 = vld [vmem:[%s370_s2] sm:$0xff] }
   0x3   :  { %49 = vperm.xlu0 %230, %v36_v1   ;;  %v30_v6 = vld [vmem:[%s368_s0] sm:$0xff]  ;;  %39 = vperm.xlu1 %231, %v34_v5  }
   0x4   :  { %75 = vmatpush.msra.mxu0 %v32_v2  ;;  %222 = vmatpush.msra.mxu1 %v32_v2 }
   0x5   :  { %12 = vsyncpa [#allocation3], 0  ;;  %v27_v7 = vld [vmem:[%s369_s1] sm:$0xff]  ;;  %vm52_vm0 = vcmask 261120   ;;  %232 = vset.pattern.permute.xlu2 %v259_v3  ;;  %v29_v8 = vld [vmem:[%s369_s1 + $0x10] sm:$0xff]  ;;  %vm119_vm1 = vcmask 195584  }
   0x6   :  { %76 = vmatpush.msra.mxu0 %v31_v4  ;;  %223 = vmatpush.msra.mxu1 %v31_v4  ;;  %v35_v9 = vld [vmem:[%s370_s2 + $0x8] sm:$0xff]  ;;  %v98_v10 = vld [vmem:[%s372_s4 + $0x18] sm:$0xff]  ;;  %v95_v12 = vld [vmem:[%s372_s4] sm:$0xff]  ;;  %s260_s12 = smov [#allocation2]   ;;  %s204_s16 = sshll.u32 %s375_s7, 4  ;;  %s205_s16 = int_to_ptr.hbm [resolvable:$true] %s204_s16 }
   0x7   :  { %v28_v11 = vld [vmem:[%s369_s1 + $0x8] sm:$0xff]  ;;  %v166_v13 = vld [vmem:[%s374_s6] sm:$0x7]  ;;  %v97_v16 = vld [vmem:[%s372_s4 + $0x10] sm:$0xff]  ;;  %s202_s13 = sshll.u32 %s260_s12, 4  ;;  %s203_s13 = int_to_ptr.vmem [resolvable:$true] %s202_s13 }
   0x8   :  { %77 = vmatpush.msra.mxu0 %v30_v6  ;;  %224 = vmatpush.msra.mxu1 %v30_v6  ;;  %v96_v20 = vld [vmem:[%s372_s4 + $0x8] sm:$0xff]  ;;  %v91_v28 = vld [vmem:[%s371_s3] sm:$0xff]  ;;  %v93_v30 = vld [vmem:[%s371_s3 + $0x10] sm:$0xff] }
   0x9   :  { %213 = vmatmul.msk.f32.vlgmr.msra.gmra.mxu0 %vm52_vm0, %v27_v7  ;;  %215 = vmatmul.msk.f32.vlgmr.msra.gmra.mxu1 %vm52_vm0, %v29_v8  ;;  %v92_v29 = vld [vmem:[%s371_s3 + $0x8] sm:$0xff]  ;;  %v94_v31 = vld [vmem:[%s371_s3 + $0x18] sm:$0xff]  ;;  %v165_v48 = vld [vmem:[%s373_s5] sm:$0x7] }
   0xa   :  { %111 = vperm.xlu2 %232, %v97_v16  }
   0xb   :  { %44 = vperm.xlu0 %230, %v35_v9   ;;  %116 = vperm.xlu1 %231, %v98_v10  }
  0x11   :  { %214 = vmatmul.msk.f32.gmra.mxu0 %vm52_vm0, %v28_v11 }
  0x12   :  { %106 = vperm.xlu2 %232, %v96_v20  }
  0x13   :  { %101 = vperm.xlu0 %230, %v95_v12   ;;  %169 = vperm.xlu1 %231, %v166_v13  }
  0x64   :  { %v112_v33 = vpop.permute.xlu2 %111 }
  0x6c   :  { %v107_v36 = vpop.permute.xlu2 %106 }
  0x75   :  { %v50_v14 = vpop.permute.xlu0 %49  ;;  %v40_v21 = vpop.permute.xlu1 %39 }
  0x7d   :  { %v45_v22 = vpop.permute.xlu0 %44  ;;  %v117_v35 = vpop.permute.xlu1 %116 }
  0x85   :  { %v102_v43 = vpop.permute.xlu0 %101  ;;  %v170_v49 = vpop.permute.xlu1 %169 }
  0x86   :  { %v79_v15 = vpop.f32.mrf.mxu0  ;;  %v85_v17 = vpop.f32.mrf.mxu1 }
  0x87   :  { %v86_v18 = vadd.f32 %v85_v17, %v50_v14  ;;  %v80_v24 = vadd.f32 %v79_v15, %v40_v21 }
  0x89   :  { %v90_v19 = vmax.f32 %v86_v18, 0.0  ;;  %v88_v27 = vmax.f32 %v80_v24, 0.0 }
  0x8b   :  { %145 = vmatpush.msrb.mxu1 %v90_v19  ;;  %225 = vmatpush.msra.mxu3 %v90_v19 }
  0x8e   :  { %v82_v23 = vpop.f32.mrf.mxu0 }
  0x8f   :  { %v83_v25 = vadd.f32 %v82_v23, %v45_v22 }
  0x91   :  { %v89_v26 = vmax.f32 %v83_v25, 0.0 }
  0x93   :  { %146 = vmatpush.msrb.mxu1 %v89_v26  ;;  %226 = vmatpush.msra.mxu3 %v89_v26 }
  0x95   :  { %147 = vmatpush.msrb.mxu1 %v88_v27  ;;  %227 = vmatpush.msra.mxu3 %v88_v27 }
  0x96   :  { %216 = vmatmul.msk.f32.vlgmr.msrb.gmra.mxu1 %vm119_vm1, %v91_v28  ;;  %217 = vmatmul.msk.f32.vlgmr.msra.gmra.mxu3 %vm119_vm1, %v92_v29 }
  0x9e   :  { %218 = vmatmul.msk.f32.gmra.mxu3 %vm119_vm1, %v93_v30 }
  0xa6   :  { %219 = vmatmul.msk.f32.gmra.mxu3 %vm119_vm1, %v94_v31 }
 0x113   :  { %v149_v40 = vpop.f32.mrf.mxu1 }
 0x114   :  { %v150_v44 = vadd.f32 %v149_v40, %v102_v43 }
 0x116   :  { %v161_v47 = vmax.f32 %v150_v44, 0.0 }
 0x119   :  { %v152_v32 = vpop.f32.mrf.mxu3 }
 0x11a   :  { %v153_v41 = vadd.f32 %v152_v32, %v107_v36 }
 0x11c   :  { %v162_v46 = vmax.f32 %v153_v41, 0.0 }
 0x121   :  { %v155_v34 = vpop.f32.mrf.mxu3 }
 0x122   :  { %v156_v38 = vadd.f32 %v155_v34, %v112_v33 }
 0x124   :  { %v163_v45 = vmax.f32 %v156_v38, 0.0 }
 0x129   :  { %v158_v37 = vpop.f32.mrf.mxu3 }
 0x12a   :  { %v159_v39 = vadd.f32 %v158_v37, %v117_v35 }
 0x12c   :  { %v164_v42 = vmax.f32 %v159_v39, 0.0 }
 0x12e   :  { %187 = vmatpush.msra.mxu2 %v164_v42 }
 0x130   :  { %188 = vmatpush.msra.mxu2 %v163_v45 }
 0x132   :  { %189 = vmatpush.msra.mxu2 %v162_v46 }
 0x134   :  { %190 = vmatpush.msra.mxu2 %v161_v47 }
 0x135   :  { %220 = vmatmul.msk.f32.vlgmr.msra.gmra.mxu2 %vm52_vm0, %v165_v48 }
 0x1b8   :  { %v192_v50 = vpop.f32.mrf.mxu2 }
 0x1b9   :  { %v193_v51 = vadd.f32 %v192_v50, %v170_v49 }
 0x1bb   :  { %v195_v52 = vmax.f32 %v193_v51, 0.0 }
 0x1bd   :  { %196 = vst [vmem:[#allocation2] sm:$0x7] %v195_v52 }
 0x1be   :  { %207 = dma.vmem_to_hbm [thread:$0]  %s203_s13, 64, %s205_s16, [#allocation3]  }
 0x1bf   :  { %257 = dma.done.wait [#allocation3], 64  }
 0x1c0   :  { %258 = vsyncadd [#allocation3], 4294967232 }
 0x1c1   :  { %212 = vsyncpa [#allocation3], 1 }

</bundles_post_ra>
